<compile_context>
chip_gen: v7x
topology: tpu7x:2x2x1
jax: 0.10.0
libtpu: 0.0.40
codegen_flags: <defaults>
</compile_context>

<pallas_src>
import functools

import jax
import jax.numpy as jnp
from jax import lax
from jax.experimental import pallas as pl
from jax.experimental.pallas import tpu as pltpu


def _round_up(x, m):
    return ((x + m - 1) // m) * m


def _cdiv(a, b):
    return -(-a // b)


def _choose_tile(batch, tile_batch):
    """Fewest/fullest tiles; >=2 tiles when batch > 128 (v7x megacore)."""
    n_tiles = max(_cdiv(batch, tile_batch), 2 if batch > 128 else 1)
    tb = _round_up(_cdiv(batch, n_tiles), 128)
    n_tiles = _cdiv(batch, tb)
    return tb, n_tiles


def _mlp_kernel(n_hidden, in_f, x_ref, w_ref, f_ref, out_ref):
    """One (TB, in_f) batch tile through the whole folded MLP.

    x_ref  : (TB, in_f) f32 — natural layout; cast + transpose fused into the
             first matmul so the batch lands on the 128-lane axis.
    w_ref  : (n_hidden, L, K) bf16 — transposed hidden weights, K = max(in_f, L),
             unused trailing columns are zero.
    f_ref  : (L, n_hidden + 2) f32 — cols 0..n_hidden-1 hidden biases,
             col n_hidden = w_last, col n_hidden+1 row 0 = b_last.
    out_ref: (1, TB) f32 — lane-dense sigmoid output.
    """
    layer_size = w_ref.shape[1]
    x = x_ref[...].astype(jnp.bfloat16)                     # (TB, in_f)
    f = f_ref[...]                                          # (L, n_hidden+2) f32

    # Layer 0: contract x's feature dim -> (L, TB).  The transpose onto the
    # lane axis is folded into the MXU matmul (XLU otherwise idle here).
    w0 = w_ref[0][:, :in_f]                                 # (L, in_f) bf16
    acc = lax.dot_general(w0, x, (((1,), (1,)), ((), ())),
                          preferred_element_type=jnp.float32)
    acc = acc + f[:, 0:1]
    h = jnp.maximum(acc, 0.0).astype(jnp.bfloat16)          # f32 VPU, bf16 for MXU

    # Remaining hidden layers: bf16 MXU operands, f32 accumulate/bias/ReLU.
    for i in range(1, n_hidden):
        wT = w_ref[i][:, :layer_size]                       # (L, L) bf16
        acc = jnp.dot(wT, h, preferred_element_type=jnp.float32) + f[:, i:i + 1]
        h = jnp.maximum(acc, 0.0).astype(jnp.bfloat16)

    # Final (L -> 1) projection: lane-dense multiply + sublane reduction
    # (skips an N=1 MXU matmul), then sigmoid on the EUP.
    w_last = f[:, n_hidden:n_hidden + 1]                    # (L, 1)
    b_last = f[0:1, n_hidden + 1:n_hidden + 2]              # (1, 1)
    logits = jnp.sum(h.astype(jnp.float32) * w_last,
                     axis=0, keepdims=True) + b_last        # (1, TB)
    out_ref[...] = jax.nn.sigmoid(logits)                   # lane-dense store


def prepare_params(params):
    """One-time parameter prep (call once per weight update, NOT per forward).

    params: list of (W (in,out), b (1,out)) f32 pairs matching nn.Sequential.
    Returns ((w_slab, f_slab), meta).
    """
    assert len(params) >= 3, "kernel assumes n_layers >= 2"
    (w0, b0), (w1, b1) = params[0], params[1]
    # Exact f32 fold of the activation-free Linear0 -> Linear1 pair.
    w01 = jnp.asarray(w0, jnp.float32) @ jnp.asarray(w1, jnp.float32)
    b01 = jnp.asarray(b0, jnp.float32) @ jnp.asarray(w1, jnp.float32) \
        + jnp.asarray(b1, jnp.float32)
    folded = [(w01, b01)] + [(jnp.asarray(w, jnp.float32),
                              jnp.asarray(b, jnp.float32)) for w, b in params[2:]]

    n_hidden = len(folded) - 1
    in_f = int(w01.shape[0])
    layer_size = int(w01.shape[1])
    kmax = max(in_f, layer_size)

    # bf16 slab of transposed hidden-layer weights (zero padded to kmax cols).
    w_slab = jnp.zeros((n_hidden, layer_size, kmax), jnp.bfloat16)
    for i, (w, _) in enumerate(folded[:-1]):
        assert w.shape[1] == layer_size
        w_slab = w_slab.at[i, :, :w.shape[0]].set(w.T.astype(jnp.bfloat16))

    # f32 slab: hidden biases | w_last | b_last (row 0).
    w_last, b_last = folded[-1]
    assert w_last.shape == (layer_size, 1)
    f_slab = jnp.zeros((layer_size, n_hidden + 2), jnp.float32)
    for i, (_, b) in enumerate(folded[:-1]):
        f_slab = f_slab.at[:, i].set(b.reshape(layer_size))
    f_slab = f_slab.at[:, n_hidden].set(w_last.reshape(layer_size))
    f_slab = f_slab.at[0, n_hidden + 1].set(b_last.reshape(()))

    meta = dict(n_hidden=n_hidden, in_f=in_f, layer_size=layer_size)
    return (w_slab, f_slab), meta


@functools.partial(jax.jit, static_argnames=("n_hidden", "in_f", "tile_batch"))
def _forward(x, w_slab, f_slab, *, n_hidden, in_f, tile_batch):
    batch = x.shape[0]
    assert x.shape[1] == in_f
    layer_size = w_slab.shape[1]

    tb, n_tiles = _choose_tile(batch, tile_batch)
    b_pad = tb * n_tiles

    kernel = functools.partial(_mlp_kernel, n_hidden, in_f)
    flops = 2 * b_pad * (in_f * layer_size
                         + (n_hidden - 1) * layer_size * layer_size
                         + layer_size)
    cost = pl.CostEstimate(
        flops=int(flops),
        transcendentals=int(b_pad),
        bytes_accessed=int(x.size * x.dtype.itemsize
                           + w_slab.size * 2 + f_slab.size * 4 + b_pad * 4))

    out = pl.pallas_call(
        kernel,
        grid=(n_tiles,),
        out_shape=jax.ShapeDtypeStruct((1, b_pad), jnp.float32),
        in_specs=[
            # contiguous (tb, in_f) batch-tile DMA; last block may be ragged
            pl.BlockSpec((tb, in_f), lambda i: (i, 0)),
            # tiny packed weight slabs: constant index_map -> VMEM-resident
            pl.BlockSpec(w_slab.shape, lambda i: (0, 0, 0)),
            pl.BlockSpec(f_slab.shape, lambda i: (0, 0)),
        ],
        out_specs=pl.BlockSpec((1, tb), lambda i: (0, i)),
        compiler_params=pltpu.CompilerParams(
            dimension_semantics=("parallel",),        # v7x: tiles split over TCs
            vmem_limit_bytes=32 * 1024 * 1024),       # safe ceiling on v5e/v6e/v7x
        cost_estimate=cost,
    )(x, w_slab, f_slab)

    # Slice + reshape stay inside this jit (same dispatch as the kernel);
    # padded columns (>= batch) are never consumed.
    return out[0, :batch].reshape(batch, 1)


def discriminator_forward(x, prepared, *, tile_batch=4096):
    """x: (B, in_size) f32; prepared = prepare_params(params)."""
    (w_slab, f_slab), meta = prepared
    return _forward(jnp.asarray(x, jnp.float32), w_slab, f_slab,
                    n_hidden=meta["n_hidden"], in_f=meta["in_f"],
                    tile_batch=tile_batch)


def init_discriminator_params(key, in_size, layer_size, n_layers):
    """nn.Linear-style init (uniform +-1/sqrt(fan_in)); W stored (in, out)."""
    dims = [in_size] + [layer_size] * n_layers + [1]
    params = []
    for i in range(len(dims) - 1):
        fan_in, fan_out = dims[i], dims[i + 1]
        key, kw, kb = jax.random.split(key, 3)
        bound = 1.0 / jnp.sqrt(jnp.float32(fan_in))
        w = jax.random.uniform(kw, (fan_in, fan_out), jnp.float32, -bound, bound)
        b = jax.random.uniform(kb, (1, fan_out), jnp.float32, -bound, bound)
        params.append((w, b))
    return params


def reference_forward(x, params):
    """Plain-JAX f32 reference with the original module's exact semantics."""
    n = len(params)
    h = x
    for i, (w, b) in enumerate(params):
        h = h @ w + b
        if 0 < i < n - 1:      # ReLU after hidden linears only (not the first)
            h = jnp.maximum(h, 0.0)
    return jax.nn.sigmoid(h)


if __name__ == "__main__":
    key = jax.random.PRNGKey(0)
    key, kp = jax.random.split(key)

    in_size = 16       # _in_size inferred from the dataloader sample in __init__
    layer_size = 32
    n_layers = 3
    params = init_discriminator_params(kp, in_size, layer_size, n_layers)
    prepared = prepare_params(params)   # one-time; hoisted out of the call path

    # covers: single tile, ragged multi-tile, larger ragged multi-tile batch
    for batch in (8, 300, 1500):
        key, kx = jax.random.split(key)
        x = jax.random.normal(kx, (batch, in_size), jnp.float32)

        out = jax.block_until_ready(discriminator_forward(x, prepared))
        ref = reference_forward(x, params)

        assert out.shape == (batch, 1), out.shape
        assert bool(jnp.all(jnp.isfinite(out)))
        err = float(jnp.max(jnp.abs(out - ref)))
        # bf16 MXU operands + folded first pair -> loosened tolerance vs f32 ref
        assert err < 2e-2, (batch, err)

    print("KERNEL_OK")
</pallas_src>

<mosaic_0001>
module attributes {stable_mosaic.version = 11 : i64} {
  func.func @_mlp_kernel(%arg0: i32, %arg1: memref<128x16xf32, #tpu.memory_space<vmem>>, %arg2: memref<2x32x32xbf16, #tpu.memory_space<vmem>>, %arg3: memref<32x4xf32, #tpu.memory_space<vmem>>, %arg4: memref<1x128xf32, #tpu.memory_space<vmem>>) attributes {dimension_semantics = [#tpu.dimension_semantics<parallel>], iteration_bounds = array<i64: 1>, scalar_prefetch = 0 : i64, scratch_operands = 0 : i64, tpu.core_type = #tpu.core_type<tc>, window_params = [{transform_indices = @transform_0, window_bounds = array<i64: 128, 16>}, {pipeline_mode = #tpu.pipeline_mode<synchronous>, transform_indices = @transform_1, window_bounds = array<i64: 2, 32, 32>}, {pipeline_mode = #tpu.pipeline_mode<synchronous>, transform_indices = @transform_2, window_bounds = array<i64: 32, 4>}, {transform_indices = @transform_3, window_bounds = array<i64: 1, 128>}]} {
    %c0 = arith.constant 0 : index
    %c0_0 = arith.constant 0 : index
    %0 = vector.load %arg1[%c0, %c0_0] : memref<128x16xf32, #tpu.memory_space<vmem>>, vector<128x16xf32>
    %1 = arith.truncf %0 : vector<128x16xf32> to vector<128x16xbf16>
    %c0_1 = arith.constant 0 : index
    %c0_2 = arith.constant 0 : index
    %2 = vector.load %arg3[%c0_1, %c0_2] : memref<32x4xf32, #tpu.memory_space<vmem>>, vector<32x4xf32>
    %c0_3 = arith.constant 0 : index
    %c0_4 = arith.constant 0 : index
    %c0_5 = arith.constant 0 : index
    %3 = vector.load %arg2[%c0_3, %c0_4, %c0_5] : memref<2x32x32xbf16, #tpu.memory_space<vmem>>, vector<1x32x32xbf16>
    %4 = vector.shape_cast %3 : vector<1x32x32xbf16> to vector<32x32xbf16>
    %5 = vector.extract_strided_slice %4 {offsets = [0, 0], sizes = [32, 16], strides = [1, 1]} : vector<32x32xbf16> to vector<32x16xbf16>
    %cst = arith.constant dense<0.000000e+00> : vector<32x128xf32>
    %6 = tpu.matmul %5, %1, %cst {dimension_numbers = #tpu.dot_dimension_numbers<[1], [1], [0], [0], [0, 0, 1, 0], [], []>} : vector<32x16xbf16>, vector<128x16xbf16>, vector<32x128xf32> -> vector<32x128xf32>
    %7 = vector.extract_strided_slice %2 {offsets = [0, 0], sizes = [32, 1], strides = [1, 1]} : vector<32x4xf32> to vector<32x1xf32>
    %8 = vector.broadcast %7 : vector<32x1xf32> to vector<32x128xf32>
    %9 = arith.addf %6, %8 : vector<32x128xf32>
    %cst_6 = arith.constant 0.000000e+00 : f32
    %10 = vector.broadcast %cst_6 : f32 to vector<32x128xf32>
    %11 = arith.maximumf %9, %10 : vector<32x128xf32>
    %12 = arith.truncf %11 : vector<32x128xf32> to vector<32x128xbf16>
    %c1 = arith.constant 1 : index
    %c0_7 = arith.constant 0 : index
    %c0_8 = arith.constant 0 : index
    %13 = vector.load %arg2[%c1, %c0_7, %c0_8] : memref<2x32x32xbf16, #tpu.memory_space<vmem>>, vector<1x32x32xbf16>
    %14 = vector.shape_cast %13 : vector<1x32x32xbf16> to vector<32x32xbf16>
    %cst_9 = arith.constant dense<0.000000e+00> : vector<32x128xf32>
    %15 = tpu.matmul %14, %12, %cst_9 {dimension_numbers = #tpu.dot_dimension_numbers<[1], [0], [0], [1], [0, 0, 1, 1], [], []>} : vector<32x32xbf16>, vector<32x128xbf16>, vector<32x128xf32> -> vector<32x128xf32>
    %16 = vector.extract_strided_slice %2 {offsets = [0, 1], sizes = [32, 1], strides = [1, 1]} : vector<32x4xf32> to vector<32x1xf32>
    %17 = vector.broadcast %16 : vector<32x1xf32> to vector<32x128xf32>
    %18 = arith.addf %15, %17 : vector<32x128xf32>
    %cst_10 = arith.constant 0.000000e+00 : f32
    %19 = vector.broadcast %cst_10 : f32 to vector<32x128xf32>
    %20 = arith.maximumf %18, %19 : vector<32x128xf32>
    %21 = arith.truncf %20 : vector<32x128xf32> to vector<32x128xbf16>
    %22 = vector.extract_strided_slice %2 {offsets = [0, 2], sizes = [32, 1], strides = [1, 1]} : vector<32x4xf32> to vector<32x1xf32>
    %23 = vector.extract_strided_slice %2 {offsets = [0, 3], sizes = [1, 1], strides = [1, 1]} : vector<32x4xf32> to vector<1x1xf32>
    %24 = arith.extf %21 : vector<32x128xbf16> to vector<32x128xf32>
    %25 = vector.broadcast %22 : vector<32x1xf32> to vector<32x128xf32>
    %26 = arith.mulf %24, %25 : vector<32x128xf32>
    %cst_11 = arith.constant dense<0.000000e+00> : vector<128xf32>
    %27 = vector.multi_reduction <add>, %26, %cst_11 [0] : vector<32x128xf32> to vector<128xf32>
    %28 = vector.shape_cast %27 : vector<128xf32> to vector<1x128xf32>
    %29 = vector.broadcast %23 : vector<1x1xf32> to vector<1x128xf32>
    %30 = arith.addf %28, %29 : vector<1x128xf32>
    %31 = arith.negf %30 : vector<1x128xf32>
    %32 = math.exp %31 : vector<1x128xf32>
    %cst_12 = arith.constant 1.000000e+00 : f32
    %33 = vector.broadcast %cst_12 : f32 to vector<1x128xf32>
    %34 = arith.addf %33, %32 : vector<1x128xf32>
    %35 = arith.divf %33, %34 : vector<1x128xf32>
    %c0_13 = arith.constant 0 : index
    %c0_14 = arith.constant 0 : index
    %36 = vector.load %arg4[%c0_13, %c0_14] : memref<1x128xf32, #tpu.memory_space<vmem>>, vector<1x128xf32>
    tpu.vector_store %arg4[%c0_13, %c0_14], %35 {strides = array<i32>} : memref<1x128xf32, #tpu.memory_space<vmem>>, vector<1x128xf32>,
    return
  }
  func.func @transform_0(%arg0: i32) -> (i32, i32) {
    %c0_i32 = arith.constant 0 : i32
    %c0_i32_0 = arith.constant 0 : i32
    return %arg0, %c0_i32 : i32, i32
  }
  func.func @transform_1(%arg0: i32) -> (i32, i32, i32) {
    %c0_i32 = arith.constant 0 : i32
    %c0_i32_0 = arith.constant 0 : i32
    %c0_i32_1 = arith.constant 0 : i32
    %c0_i32_2 = arith.constant 0 : i32
    return %c0_i32, %c0_i32_0, %c0_i32_1 : i32, i32, i32
  }
  func.func @transform_2(%arg0: i32) -> (i32, i32) {
    %c0_i32 = arith.constant 0 : i32
    %c0_i32_0 = arith.constant 0 : i32
    %c0_i32_1 = arith.constant 0 : i32
    return %c0_i32, %c0_i32_0 : i32, i32
  }
  func.func @transform_3(%arg0: i32) -> (i32, i32) {
    %c0_i32 = arith.constant 0 : i32
    %c0_i32_0 = arith.constant 0 : i32
    return %c0_i32, %arg0 : i32, i32
  }
}

</mosaic_0001>

<bundles_post_ra>
// kernel: _forward.1
= control target key start
LH: loop header
LB: loop body
LE: loop exit
PB: predicated region body
PF: predicated region fallthrough
CT: control target
= control target key end

     0   :  { %8 = vsyncpa [#allocation3], 0  ;;  %s521_s0 = inlined_call_operand.hbm [shape: f32[8,16], index: 0, kind: input, shape index: {}]   ;;  %s522_s1 = inlined_call_operand.vmem [shape: bf16[2,32,32], index: 1, kind: input, shape index: {}]   ;;  %s523_s2 = inlined_call_operand.vmem [shape: f32[32,4], index: 2, kind: input, shape index: {}]   ;;  %s524_s3 = inlined_call_operand.vmem [shape: f32[1,128], index: 3, kind: output, shape index: {}]  }
   0x1   :  { %13 = vsyncadd [#allocation3], 1920  ;;  %s429_s12 = smov [#allocation2]   ;;  %s405_s16 = scalar_lea.hbm %s521_s0, 128 }
   0x2   :  { %s14_s13 = sshll.u32 %s429_s12, 4  ;;  %p406_p0 = scmp.ne.s32.totalorder %s521_s0, %s405_s16  ;;  %s15_s13 = int_to_ptr.vmem [resolvable:$true] %s14_s13 }
   0x3   :  { %p409_p1 = scmp.lt.u32.totalorder %s405_s16, %s521_s0 }
   0x5   :  { %p411_p2 = pnand %p409_p1, %p406_p0 }
   0x7   :  { %414 = shalt.err (!%p411_p2)
}
   0x8   :  { %s415_s21 = scalar_lea.vmem %s15_s13, 128  ;;  %s419_s22 = scalar_lea.vmem %s15_s13, 2048 }
   0x9   :  { %p416_p3 = scmp.ne.s32.totalorder %s15_s13, %s415_s21  ;;  %p420_p4 = scmp.lt.s32.totalorder %s15_s13, %s15_s13 }
   0xa   :  { %p421_p5 = scmp.lt.s32.totalorder %s419_s22, %s415_s21 }
   0xc   :  { %p422_p6 = por %p421_p5, %p420_p4 }
   0xe   :  { %p423_p7 = pnand %p422_p6, %p416_p3 }
  0x10   :  { %426 = shalt.err (!%p423_p7)
}
  0x11   :  { %s430_s23 = smov 128   ;;  %s431_s24 = smov 8  }
  0x12   :  { %20 = dma.hbm_to_vmem [thread:$0]  %s521_s0, 128, %s15_s13, [#allocation3], %s430_s23, %s430_s23, %s431_s24  }
  0x13   :  { %427 = dma.done.wait [#allocation3], 2048  }
  0x14   :  { %428 = vsyncadd [#allocation3], 4294965248  ;;  %v432_v0 = vmov 0   ;;  %v29_v1 = vld [vmem:[#allocation2] sm:$0xff]  ;;  %v30_v2 = vld [vmem:[#allocation2 + $0x8] sm:$0xff]  ;;  %vm91_vm0 = vcmask 130048  }
  0x15   :  { %390 = vset.pattern.permute.xlu0 %v432_v0  ;;  %391 = vset.pattern.permute.xlu1 %v432_v0  ;;  %v31_v3 = vld [vmem:[#allocation2 + $0x10] sm:$0xff]  ;;  %v45_v4 = vpack.c.bf16 %v30_v2, %v29_v1  ;;  %v32_v5 = vld [vmem:[#allocation2 + $0x18] sm:$0xff]  ;;  %v33_v8 = vld [vmem:[#allocation2 + $0x20] sm:$0xff]  ;;  %vm208_vm1 = vcmask 261120   ;;  %v433_v40 = vmov 1   ;;  %v434_v41 = vmov 2  }
  0x16   :  { %v46_v6 = vpack.c.bf16 %v32_v5, %v31_v3  ;;  %v34_v9 = vld [vmem:[#allocation2 + $0x28] sm:$0xff]  ;;  %v397_v10 = vld [vmem:[%s522_s1] sm:$0xff]   ;;  %v55_v12 = vld [vmem:[%s523_s2 + $0x10] sm:$0xff]  ;;  %v435_v42 = vmov 3  }
  0x17   :  { %375 = vmatprep.subr.msk.bf16.mxu0 %vm91_vm0, %v45_v4  ;;  %v99_v7 = vsel %vm91_vm0, %v45_v4, 0  ;;  %v477_v11 = vld [vmem:[%s523_s2] sm:$0xff]  ;;  %363 = vmatprep.mubr.msk.bf16.mxu0 %vm91_vm0, %v397_v10  ;;  %v54_v14 = vld [vmem:[%s523_s2 + $0x8] sm:$0xff]  ;;  %v47_v15 = vpack.c.bf16 %v34_v9, %v33_v8  ;;  %v56_v16 = vld [vmem:[%s523_s2 + $0x18] sm:$0xff] }
  0x18   :  { %348 = vmatpush3.bf16.xpose.msra.mxu0 %v99_v7  ;;  %v102_v13 = vsel %vm91_vm0, %v46_v6, 0  ;;  %63 = vperm.xlu0 %390, %v477_v11   ;;  %v35_v17 = vld [vmem:[#allocation2 + $0x30] sm:$0xff]  ;;  %v36_v18 = vld [vmem:[#allocation2 + $0x38] sm:$0xff]  ;;  %v37_v21 = vld [vmem:[#allocation2 + $0x40] sm:$0xff] }
  0x19   :  { %376 = vmatprep.subr.msk.bf16.mxu0 %vm91_vm0, %v46_v6  ;;  %73 = vperm.xlu1 %391, %v55_v12   ;;  %v105_v19 = vsel %vm91_vm0, %v47_v15, 0  ;;  %v48_v20 = vpack.c.bf16 %v36_v18, %v35_v17  ;;  %v38_v22 = vld [vmem:[#allocation2 + $0x48] sm:$0xff]  ;;  %v39_v25 = vld [vmem:[#allocation2 + $0x50] sm:$0xff]  ;;  %v40_v26 = vld [vmem:[#allocation2 + $0x58] sm:$0xff] }
  0x1a   :  { %v49_v24 = vpack.c.bf16 %v38_v22, %v37_v21  ;;  %v50_v28 = vpack.c.bf16 %v40_v26, %v39_v25  ;;  %v41_v29 = vld [vmem:[#allocation2 + $0x60] sm:$0xff]  ;;  %v42_v30 = vld [vmem:[#allocation2 + $0x68] sm:$0xff]  ;;  %v43_v33 = vld [vmem:[#allocation2 + $0x70] sm:$0xff] }
  0x1b   :  { %v108_v23 = vsel %vm91_vm0, %v48_v20, 0  ;;  %v51_v32 = vpack.c.bf16 %v42_v30, %v41_v29  ;;  %v44_v34 = vld [vmem:[#allocation2 + $0x78] sm:$0xff]  ;;  %v398_v38 = vld [vmem:[%s522_s1 + $0x8] sm:$0xff]   ;;  %v399_v39 = vld [vmem:[%s522_s1 + $0x10] sm:$0xff]  }
  0x1c   :  { %68 = vperm.xlu0 %390, %v54_v14   ;;  %v111_v27 = vsel %vm91_vm0, %v49_v24, 0  ;;  %v114_v31 = vsel %vm91_vm0, %v50_v28, 0  ;;  %v52_v36 = vpack.c.bf16 %v44_v34, %v43_v33  ;;  %371 = vmatprep.mubr.msk.bf16.mxu1 %vm208_vm1, %v399_v39  ;;  %v400_v61 = vld [vmem:[%s522_s1 + $0x18] sm:$0xff]  }
  0x1d   :  { %78 = vperm.xlu1 %391, %v56_v16   ;;  %v117_v35 = vsel %vm91_vm0, %v51_v32, 0 }
  0x1e   :  { %v120_v37 = vsel %vm91_vm0, %v52_v36, 0 }
  0x20   :  { %350 = vmatpush3.bf16.xpose.msra.mxu0 %v102_v13  ;;  %392 = vset.pattern.permute.xlu0 %v433_v40 }
  0x21   :  { %377 = vmatprep.subr.msk.bf16.mxu0 %vm91_vm0, %v47_v15  ;;  %393 = vset.pattern.permute.xlu1 %v433_v40 }
  0x22   :  { %187 = vperm.xlu1 %393, %v54_v14   ;;  %183 = vperm.xlu0 %392, %v477_v11  }
  0x26   :  { %191 = vperm.xlu1 %393, %v55_v12   ;;  %195 = vperm.xlu0 %392, %v56_v16  }
  0x28   :  { %352 = vmatpush3.bf16.xpose.msra.mxu0 %v105_v19 }
  0x29   :  { %378 = vmatprep.subr.msk.bf16.mxu0 %vm91_vm0, %v48_v20 }
  0x2a   :  { %394 = vset.pattern.permute.xlu1 %v434_v41  ;;  %395 = vset.pattern.permute.xlu0 %v434_v41 }
  0x2b   :  { %275 = vperm.xlu1 %394, %v477_v11   ;;  %279 = vperm.xlu0 %395, %v54_v14  }
  0x2f   :  { %283 = vperm.xlu1 %394, %v55_v12   ;;  %396 = vset.pattern.permute.xlu0 %v435_v42 }
  0x30   :  { %354 = vmatpush3.bf16.xpose.msra.mxu0 %v108_v23  ;;  %304 = vperm.xlu0 %396, %v477_v11  }
  0x31   :  { %379 = vmatprep.subr.msk.bf16.mxu0 %vm91_vm0, %v49_v24 }
  0x33   :  { %287 = vperm.xlu1 %394, %v56_v16  }
  0x38   :  { %356 = vmatpush3.bf16.xpose.msra.mxu0 %v111_v27 }
  0x39   :  { %380 = vmatprep.subr.msk.bf16.mxu0 %vm91_vm0, %v50_v28 }
  0x40   :  { %358 = vmatpush3.bf16.xpose.msra.mxu0 %v114_v31 }
  0x41   :  { %381 = vmatprep.subr.msk.bf16.mxu0 %vm91_vm0, %v51_v32 }
  0x48   :  { %360 = vmatpush3.bf16.xpose.msra.mxu0 %v117_v35 }
  0x49   :  { %382 = vmatprep.subr.msk.bf16.mxu0 %vm91_vm0, %v52_v36 }
  0x50   :  { %362 = vmatpush3.bf16.xpose.msra.mxu0 %v120_v37 }
  0x57   :  { %364 = vmatmul.mubr.msk.bf16.vlgmr.msra.gmra.mrb[0].mxu0 %vm91_vm0, %v398_v38 }
  0x97   :  { %v64_v44 = vpop.permute.xlu0 %63 }
  0x98   :  { %v74_v43 = vpop.permute.xlu1 %73 }
  0x9b   :  { %v69_v51 = vpop.permute.xlu0 %68 }
  0x9c   :  { %v79_v46 = vpop.permute.xlu1 %78 }
  0xa1   :  { %v188_v62 = vpop.permute.xlu1 %187  ;;  %v184_v63 = vpop.permute.xlu0 %183 }
  0xa5   :  { %v192_v0 = vpop.permute.xlu1 %191  ;;  %v196_v2 = vpop.permute.xlu0 %195 }
  0xaa   :  { %v276_v7 = vpop.permute.xlu1 %275  ;;  %v280_v18 = vpop.permute.xlu0 %279 }
  0xae   :  { %v284_v17 = vpop.permute.xlu1 %283 }
  0xaf   :  { %v305_v36 = vpop.permute.xlu0 %304 }
  0xb2   :  { %v288_v27 = vpop.permute.xlu1 %287 }
 0x12a   :  { %v365_v45 = vpop.f32.mrb[0].mxu0 }
 0x12b   :  { %v165_v47 = vadd.f32 %v365_v45, %v74_v43  ;;  %v156_v48 = vpop.f32.mrb[1].mxu0 }
 0x12c   :  { %v157_v49 = vadd.f32 %v156_v48, %v64_v44  ;;  %v366_v50 = vpop.f32.mrb[2].mxu0 }
 0x12d   :  { %v168_v52 = vadd.f32 %v366_v50, %v79_v46  ;;  %v159_v53 = vpop.f32.mrb[3].mxu0  ;;  %v173_v55 = vmax.f32 %v165_v47, 0.0 }
 0x12e   :  { %v160_v54 = vadd.f32 %v159_v53, %v69_v51  ;;  %v171_v57 = vmax.f32 %v157_v49, 0.0 }
 0x12f   :  { %v174_v56 = vmax.f32 %v168_v52, 0.0 }
 0x130   :  { %v172_v58 = vmax.f32 %v160_v54, 0.0 }
 0x131   :  { %v176_v59 = vpack.c.bf16 %v174_v56, %v173_v55 }
 0x132   :  { %v175_v60 = vpack.c.bf16 %v172_v58, %v171_v57 }
 0x134   :  { %367 = vmatprep.subr.bf16.mxu1 %v175_v60 }
 0x135   :  { %368 = vmatpush3.bf16.msra.mxu1 %v175_v60 }
 0x136   :  { %369 = vmatprep.subr.bf16.mxu1 %v176_v59 }
 0x139   :  { %370 = vmatpush3.bf16.msra.mxu1 %v176_v59 }
 0x13c   :  { %372 = vmatmul.mubr.msk.bf16.vlgmr.msra.gmra.mrb[0].mxu1 %vm208_vm1, %v400_v61 }
 0x20f   :  { %v373_v1 = vpop.f32.mrb[0].mxu1 }
 0x210   :  { %v258_v3 = vadd.f32 %v373_v1, %v192_v0  ;;  %v249_v4 = vpop.f32.mrb[1].mxu1 }
 0x211   :  { %v250_v5 = vadd.f32 %v249_v4, %v184_v63  ;;  %v374_v6 = vpop.f32.mrb[2].mxu1 }
 0x212   :  { %v261_v8 = vadd.f32 %v374_v6, %v196_v2  ;;  %v252_v9 = vpop.f32.mrb[3].mxu1  ;;  %v266_v11 = vmax.f32 %v258_v3, 0.0 }
 0x213   :  { %v253_v10 = vadd.f32 %v252_v9, %v188_v62  ;;  %v264_v13 = vmax.f32 %v250_v5, 0.0 }
 0x214   :  { %v267_v12 = vmax.f32 %v261_v8, 0.0 }
 0x215   :  { %v265_v14 = vmax.f32 %v253_v10, 0.0 }
 0x216   :  { %v269_v15 = vpack.c.bf16 %v267_v12, %v266_v11 }
 0x217   :  { %v268_v16 = vpack.c.bf16 %v265_v14, %v264_v13 }
 0x218   :  { %v272_v19 = vunpack.c.l.bf16 %v269_v15  ;;  %v273_v22 = vunpack.c.h.bf16 %v269_v15 }
 0x219   :  { %v270_v20 = vunpack.c.l.bf16 %v268_v16  ;;  %v271_v21 = vunpack.c.h.bf16 %v268_v16 }
 0x21a   :  { %v292_v25 = vmul.f32 %v284_v17, %v272_v19  ;;  %v293_v28 = vmul.f32 %v288_v27, %v273_v22 }
 0x21b   :  { %v290_v23 = vmul.f32 %v276_v7, %v270_v20  ;;  %v291_v24 = vmul.f32 %v280_v18, %v271_v21 }
 0x21d   :  { %v294_v26 = vadd.f32 %v291_v24, %v290_v23 }
 0x21f   :  { %v295_v29 = vadd.f32 %v294_v26, %v292_v25 }
 0x221   :  { %v296_v30 = vadd.f32 %v295_v29, %v293_v28 }
 0x223   :  { %v297_v31 = vrot.slane %v296_v30, 4 }
 0x225   :  { %v298_v32 = vadd.f32 %v297_v31, %v296_v30 }
 0x227   :  { %v299_v33 = vrot.slane %v298_v32, 2 }
 0x229   :  { %v300_v34 = vadd.f32 %v299_v33, %v298_v32 }
 0x22b   :  { %v301_v35 = vrot.slane %v300_v34, 1 }
 0x22d   :  { %v302_v37 = vadd.f32 %v301_v35, %v300_v34 }
 0x22f   :  { %v307_v38 = vadd.f32 %v305_v36, %v302_v37 }
 0x231   :  { %v332_v39 = vmul.f32 -1.442695, %v307_v38 }
 0x233   :  { %401 = vpow2.f32 %v332_v39 }
 0x23d   :  { %v402_v40 = vpop.eup %401 }
 0x23e   :  { %v311_v41 = vadd.f32 1.0, %v402_v40 }
 0x240   :  { %403 = vrcp.f32 %v311_v41 }
 0x24a   :  { %v404_v42 = vpop.eup %403 }
 0x24b   :  { %314 = vst [vmem:[%s524_s3] sm:$0x1] %v404_v42 }
 0x24c   :  { %319 = vsyncpa [#allocation3], 1 }

</bundles_post_ra>
